<compile_context>
chip_gen: v6e
topology: v6e:2x2x1
jax: 0.10.0
libtpu: 0.0.40
codegen_flags: <defaults>
</compile_context>

<pallas_src>
import math

import jax
import jax.numpy as jnp
from jax.experimental import pallas as pl
from jax.experimental.pallas import tpu as pltpu


def autoencoder_kernel(x_ref, we_ref, be_ref, wd_ref, bd_ref, o_ref):
    # encoder: (TM, Dp) @ (Dp, Ep) -> f32 acc; bias + ReLU in f32
    x = x_ref[...].astype(jnp.bfloat16)            # no-op if already bf16
    h = jnp.dot(x, we_ref[...], preferred_element_type=jnp.float32)
    h = jnp.maximum(h + be_ref[...], 0.0)
    # decoder: (TM, Ep) @ (Ep, Dp) -> f32 acc; bias + sigmoid
    y = jnp.dot(h.astype(jnp.bfloat16), wd_ref[...],
                preferred_element_type=jnp.float32)
    y = y + bd_ref[...]
    # sigmoid via EUP exp + approximate reciprocal (avoids a VPU divide)
    s = pl.reciprocal(1.0 + jnp.exp(-y), approx=True)
    o_ref[...] = s.astype(o_ref.dtype)


def _round_up(x, m):
    return ((x + m - 1) // m) * m


def _device_kind():
    try:
        return jax.devices()[0].device_kind.lower()
    except Exception:  # pragma: no cover - defensive
        return ""


def _batch_tiling(batch, kind):
    """Pick (TM, B_pad): minimal padding, >= 2 grid steps on v7x (2 TCs/chip)."""
    pref = 256
    n_tiles = max(1, -(-batch // pref))
    if "v7" in kind and batch >= 16:
        n_tiles = max(n_tiles, 2)          # feed both TensorCores
    tm = _round_up(-(-batch // n_tiles), 8)
    return tm, _round_up(batch, tm)


def _vmem_limit_bytes(kind, tm, d_pad, e_pad, x_bytes, out_bytes):
    need = (2 * tm * d_pad * (x_bytes + out_bytes)          # x + out, double-buffered
            + 2 * (2 * d_pad * e_pad * 2                    # w_enc + w_dec (bf16)
                   + (e_pad + d_pad) * 4))                  # biases (f32)
    need = int(need * 1.25) + (2 << 20)                     # headroom
    cap = (56 << 20) if "v7" in kind else (100 << 20)       # v7x has 64 MiB physical
    return max(min(need, cap), 32 << 20)


def autoencoder_forward(x_img, w_enc, b_enc, w_dec, b_dec,
                        out_dtype=jnp.bfloat16):
    """x_img: (B, C, H, W).

    w_enc: (D, E), b_enc: (E,), w_dec: (E, D), b_dec: (D,)  with D = C*H*W.
    Returns the (B, D) reconstruction (flattened, like the PyTorch module).
    """
    B = x_img.shape[0]
    D = math.prod(x_img.shape[1:])
    E = w_enc.shape[1]
    kind = _device_kind()

    # ---- tiling / padding choices ------------------------------------------
    TM, B_pad = _batch_tiling(B, kind)
    e_mult = 128 if "v5" in kind else 256        # MXU-native N/K width
    E_pad = max(e_mult, _round_up(E, e_mult))
    D_pad = max(128, _round_up(D, 128))          # lane-dense blocks / stores

    # ---- plain-JAX staging: at most one pass over x -------------------------
    x = x_img.reshape(B, D)
    pad_b, pad_d = B_pad - B, D_pad - D
    if pad_b or pad_d:
        # cast first so cast + pad fuse into a single bf16 staging pass
        x_in = jnp.pad(x.astype(jnp.bfloat16), ((0, pad_b), (0, pad_d)))
    else:
        x_in = x.astype(jnp.float32)             # bf16 cast happens in-kernel

    # Zero padding keeps the math exact (padded contributions are zero).
    w_enc_p = jnp.pad(w_enc.astype(jnp.bfloat16), ((0, pad_d), (0, E_pad - E)))
    b_enc_p = jnp.pad(b_enc.astype(jnp.float32), ((0, E_pad - E),)).reshape(1, E_pad)
    w_dec_p = jnp.pad(w_dec.astype(jnp.bfloat16), ((0, E_pad - E), (0, pad_d)))
    b_dec_p = jnp.pad(b_dec.astype(jnp.float32), ((0, pad_d),)).reshape(1, D_pad)

    grid = (B_pad // TM,)
    x_bytes = x_in.dtype.itemsize
    out_bytes = jnp.dtype(out_dtype).itemsize

    cost = pl.CostEstimate(
        flops=4 * B_pad * D_pad * E_pad,             # two matmuls, 2*M*N*K each
        transcendentals=2 * B_pad * D_pad,           # exp + approx reciprocal
        bytes_accessed=(B_pad * D_pad * x_bytes          # x
                        + 2 * D_pad * E_pad * 2          # w_enc + w_dec (bf16)
                        + (E_pad + D_pad) * 4            # biases (f32)
                        + B_pad * D_pad * out_bytes),    # output
    )

    cparams = pltpu.CompilerParams(
        dimension_semantics=("parallel",),
        vmem_limit_bytes=_vmem_limit_bytes(kind, TM, D_pad, E_pad,
                                           x_bytes, out_bytes),
    )

    def run(weight_mode):
        wkw = {} if weight_mode is None else {"pipeline_mode": weight_mode}
        in_specs = [
            pl.BlockSpec((TM, D_pad), lambda i: (i, 0)),            # x: batch-tiled
            pl.BlockSpec((D_pad, E_pad), lambda i: (0, 0), **wkw),  # w_enc: resident
            pl.BlockSpec((1, E_pad), lambda i: (0, 0), **wkw),      # b_enc
            pl.BlockSpec((E_pad, D_pad), lambda i: (0, 0), **wkw),  # w_dec: resident
            pl.BlockSpec((1, D_pad), lambda i: (0, 0), **wkw),      # b_dec
        ]
        return pl.pallas_call(
            autoencoder_kernel,
            out_shape=jax.ShapeDtypeStruct((B_pad, D_pad), out_dtype),
            grid=grid,
            in_specs=in_specs,
            out_specs=pl.BlockSpec((TM, D_pad), lambda i: (i, 0)),
            compiler_params=cparams,
            cost_estimate=cost,
        )(x_in, w_enc_p, b_enc_p, w_dec_p, b_dec_p)

    try:
        # Single-buffer the grid-invariant weights/biases (halves their VMEM).
        out = run(pl.Buffered(1))
    except Exception:  # pragma: no cover - pipeline_mode unsupported on this jax
        out = run(None)

    return out[:B, :D]                               # drop batch/feature padding


def reference_forward(x_img, w_enc, b_enc, w_dec, b_dec):
    B = x_img.shape[0]
    x = x_img.reshape(B, -1)
    h = jnp.maximum(x @ w_enc + b_enc, 0.0)
    return jax.nn.sigmoid(h @ w_dec + b_dec)


if __name__ == "__main__":
    # Shapes consistent with the module: 16x16 single-channel "images",
    # vector_size = 256, encoding_dim = 32.
    C, H, W = 1, 16, 16
    D = C * H * W
    encoding_dim = 32

    key = jax.random.PRNGKey(0)
    kx, kwe, kbe, kwd, kbd = jax.random.split(key, 5)

    # Deterministic init mimicking nn.Linear's U(-1/sqrt(fan_in), 1/sqrt(fan_in)).
    # Weights stored as (in_features, out_features) == PyTorch weight.T.
    bound_e = 1.0 / (D ** 0.5)
    w_enc = jax.random.uniform(kwe, (D, encoding_dim), jnp.float32, -bound_e, bound_e)
    b_enc = jax.random.uniform(kbe, (encoding_dim,), jnp.float32, -bound_e, bound_e)

    bound_d = 1.0 / (encoding_dim ** 0.5)
    w_dec = jax.random.uniform(kwd, (encoding_dim, D), jnp.float32, -bound_d, bound_d)
    b_dec = jax.random.uniform(kbd, (D,), jnp.float32, -bound_d, bound_d)

    # Two configurations: (multi-step grid, no padding, bf16 out) and
    # (padded batch, f32 out) to exercise both staging paths.
    for batch, out_dtype in ((16, jnp.bfloat16), (5, jnp.float32)):
        x_img = jax.random.uniform(kx, (batch, C, H, W), dtype=jnp.float32)

        out = autoencoder_forward(x_img, w_enc, b_enc, w_dec, b_dec,
                                  out_dtype=out_dtype)
        out = jax.block_until_ready(out)

        ref = reference_forward(x_img, w_enc, b_enc, w_dec, b_dec)
        assert out.shape == (batch, D), out.shape
        err = float(jnp.max(jnp.abs(out.astype(jnp.float32) - ref)))
        # Tolerance accounts for bf16 matmul operands / bf16 output / approx recip.
        assert err < 2e-2, err

    print("KERNEL_OK")
</pallas_src>

<mosaic_0001>
module attributes {stable_mosaic.version = 11 : i64} {
  func.func @autoencoder_kernel(%arg0: i32, %arg1: memref<16x256xf32, #tpu.memory_space<vmem>>, %arg2: memref<256x256xbf16, #tpu.memory_space<vmem>>, %arg3: memref<1x256xf32, #tpu.memory_space<vmem>>, %arg4: memref<256x256xbf16, #tpu.memory_space<vmem>>, %arg5: memref<1x256xf32, #tpu.memory_space<vmem>>, %arg6: memref<16x256xbf16, #tpu.memory_space<vmem>>) attributes {dimension_semantics = [#tpu.dimension_semantics<parallel>], iteration_bounds = array<i64: 1>, scalar_prefetch = 0 : i64, scratch_operands = 0 : i64, tpu.core_type = #tpu.core_type<tc>, window_params = [{transform_indices = @transform_0, window_bounds = array<i64: 16, 256>}, {pipeline_mode = #tpu.pipeline_mode<synchronous>, transform_indices = @transform_1, window_bounds = array<i64: 256, 256>}, {pipeline_mode = #tpu.pipeline_mode<synchronous>, transform_indices = @transform_2, window_bounds = array<i64: 1, 256>}, {pipeline_mode = #tpu.pipeline_mode<synchronous>, transform_indices = @transform_3, window_bounds = array<i64: 256, 256>}, {pipeline_mode = #tpu.pipeline_mode<synchronous>, transform_indices = @transform_4, window_bounds = array<i64: 1, 256>}, {transform_indices = @transform_5, window_bounds = array<i64: 16, 256>}]} {
    %c0 = arith.constant 0 : index
    %c0_0 = arith.constant 0 : index
    %0 = vector.load %arg1[%c0, %c0_0] : memref<16x256xf32, #tpu.memory_space<vmem>>, vector<16x256xf32>
    %1 = arith.truncf %0 : vector<16x256xf32> to vector<16x256xbf16>
    %c0_1 = arith.constant 0 : index
    %c0_2 = arith.constant 0 : index
    %2 = vector.load %arg2[%c0_1, %c0_2] : memref<256x256xbf16, #tpu.memory_space<vmem>>, vector<256x256xbf16>
    %cst = arith.constant dense<0.000000e+00> : vector<16x256xf32>
    %3 = tpu.matmul %1, %2, %cst {dimension_numbers = #tpu.dot_dimension_numbers<[1], [0], [0], [1], [0, 0, 1, 1], [], []>} : vector<16x256xbf16>, vector<256x256xbf16>, vector<16x256xf32> -> vector<16x256xf32>
    %c0_3 = arith.constant 0 : index
    %c0_4 = arith.constant 0 : index
    %4 = vector.load %arg3[%c0_3, %c0_4] : memref<1x256xf32, #tpu.memory_space<vmem>>, vector<1x256xf32>
    %5 = vector.broadcast %4 : vector<1x256xf32> to vector<16x256xf32>
    %6 = arith.addf %3, %5 : vector<16x256xf32>
    %cst_5 = arith.constant 0.000000e+00 : f32
    %7 = vector.broadcast %cst_5 : f32 to vector<16x256xf32>
    %8 = arith.maximumf %6, %7 : vector<16x256xf32>
    %9 = arith.truncf %8 : vector<16x256xf32> to vector<16x256xbf16>
    %c0_6 = arith.constant 0 : index
    %c0_7 = arith.constant 0 : index
    %10 = vector.load %arg4[%c0_6, %c0_7] : memref<256x256xbf16, #tpu.memory_space<vmem>>, vector<256x256xbf16>
    %cst_8 = arith.constant dense<0.000000e+00> : vector<16x256xf32>
    %11 = tpu.matmul %9, %10, %cst_8 {dimension_numbers = #tpu.dot_dimension_numbers<[1], [0], [0], [1], [0, 0, 1, 1], [], []>} : vector<16x256xbf16>, vector<256x256xbf16>, vector<16x256xf32> -> vector<16x256xf32>
    %c0_9 = arith.constant 0 : index
    %c0_10 = arith.constant 0 : index
    %12 = vector.load %arg5[%c0_9, %c0_10] : memref<1x256xf32, #tpu.memory_space<vmem>>, vector<1x256xf32>
    %13 = vector.broadcast %12 : vector<1x256xf32> to vector<16x256xf32>
    %14 = arith.addf %11, %13 : vector<16x256xf32>
    %cst_11 = arith.constant 0.000000e+00 : f32
    %15 = vector.broadcast %cst_11 : f32 to vector<16x256xf32>
    %16 = arith.subf %15, %14 : vector<16x256xf32>
    %17 = math.exp %16 : vector<16x256xf32>
    %cst_12 = arith.constant 1.000000e+00 : f32
    %18 = vector.broadcast %cst_12 : f32 to vector<16x256xf32>
    %19 = arith.addf %18, %17 : vector<16x256xf32>
    %20 = tpu.reciprocal %19 {approx = true} : vector<16x256xf32> -> vector<16x256xf32>
    %21 = arith.truncf %20 : vector<16x256xf32> to vector<16x256xbf16>
    %c0_13 = arith.constant 0 : index
    %c0_14 = arith.constant 0 : index
    %22 = vector.load %arg6[%c0_13, %c0_14] : memref<16x256xbf16, #tpu.memory_space<vmem>>, vector<16x256xbf16>
    tpu.vector_store %arg6[%c0_13, %c0_14], %21 {strides = array<i32>} : memref<16x256xbf16, #tpu.memory_space<vmem>>, vector<16x256xbf16>,
    return
  }
  func.func @transform_0(%arg0: i32) -> (i32, i32) {
    %c0_i32 = arith.constant 0 : i32
    %c0_i32_0 = arith.constant 0 : i32
    return %arg0, %c0_i32 : i32, i32
  }
  func.func @transform_1(%arg0: i32) -> (i32, i32) {
    %c0_i32 = arith.constant 0 : i32
    %c0_i32_0 = arith.constant 0 : i32
    %c0_i32_1 = arith.constant 0 : i32
    return %c0_i32, %c0_i32_0 : i32, i32
  }
  func.func @transform_2(%arg0: i32) -> (i32, i32) {
    %c0_i32 = arith.constant 0 : i32
    %c0_i32_0 = arith.constant 0 : i32
    %c0_i32_1 = arith.constant 0 : i32
    return %c0_i32, %c0_i32_0 : i32, i32
  }
  func.func @transform_3(%arg0: i32) -> (i32, i32) {
    %c0_i32 = arith.constant 0 : i32
    %c0_i32_0 = arith.constant 0 : i32
    %c0_i32_1 = arith.constant 0 : i32
    return %c0_i32, %c0_i32_0 : i32, i32
  }
  func.func @transform_4(%arg0: i32) -> (i32, i32) {
    %c0_i32 = arith.constant 0 : i32
    %c0_i32_0 = arith.constant 0 : i32
    %c0_i32_1 = arith.constant 0 : i32
    return %c0_i32, %c0_i32_0 : i32, i32
  }
  func.func @transform_5(%arg0: i32) -> (i32, i32) {
    %c0_i32 = arith.constant 0 : i32
    %c0_i32_0 = arith.constant 0 : i32
    return %arg0, %c0_i32 : i32, i32
  }
}

module attributes {stable_mosaic.version = 11 : i64} {
  func.func @autoencoder_kernel(%arg0: i32, %arg1: memref<16x256xf32, #tpu.memory_space<vmem>>, %arg2: memref<256x256xbf16, #tpu.memory_space<vmem>>, %arg3: memref<1x256xf32, #tpu.memory_space<vmem>>, %arg4: memref<256x256xbf16, #tpu.memory_space<vmem>>, %arg5: memref<1x256xf32, #tpu.memory_space<vmem>>, %arg6: memref<16x256xbf16, #tpu.memory_space<vmem>>) attributes {dimension_semantics = [#tpu.dimension_semantics<parallel>], iteration_bounds = array<i64: 1>, scalar_prefetch = 0 : i64, scratch_operands = 0 : i64, tpu.core_type = #tpu.core_type<tc>, window_params = [{transform_indices = @transform_0, window_bounds = array<i64: 16, 256>}, {pipeline_mode = #tpu.pipeline_mode<synchronous>, transform_indices = @transform_1, window_bounds = array<i64: 256, 256>}, {pipeline_mode = #tpu.pipeline_mode<synchronous>, transform_indices = @transform_2, window_bounds = array<i64: 1, 256>}, {pipeline_mode = #tpu.pipeline_mode<synchronous>, transform_indices = @transform_3, window_bounds = array<i64: 256, 256>}, {pipeline_mode = #tpu.pipeline_mode<synchronous>, transform_indices = @transform_4, window_bounds = array<i64: 1, 256>}, {transform_indices = @transform_5, window_bounds = array<i64: 16, 256>}]} {
    %c0 = arith.constant 0 : index
    %c0_0 = arith.constant 0 : index
    %0 = vector.load %arg1[%c0, %c0_0] : memref<16x256xf32, #tpu.memory_space<vmem>>, vector<16x256xf32>
    %1 = arith.truncf %0 : vector<16x256xf32> to vector<16x256xbf16>
    %c0_1 = arith.constant 0 : index
    %c0_2 = arith.constant 0 : index
    %2 = vector.load %arg2[%c0_1, %c0_2] : memref<256x256xbf16, #tpu.memory_space<vmem>>, vector<256x256xbf16>
    %cst = arith.constant dense<0.000000e+00> : vector<16x256xf32>
    %3 = tpu.matmul %1, %2, %cst {dimension_numbers = #tpu.dot_dimension_numbers<[1], [0], [0], [1], [0, 0, 1, 1], [], []>} : vector<16x256xbf16>, vector<256x256xbf16>, vector<16x256xf32> -> vector<16x256xf32>
    %c0_3 = arith.constant 0 : index
    %c0_4 = arith.constant 0 : index
    %4 = vector.load %arg3[%c0_3, %c0_4] : memref<1x256xf32, #tpu.memory_space<vmem>>, vector<1x256xf32>
    %5 = vector.broadcast %4 : vector<1x256xf32> to vector<16x256xf32>
    %6 = arith.addf %3, %5 : vector<16x256xf32>
    %cst_5 = arith.constant 0.000000e+00 : f32
    %7 = vector.broadcast %cst_5 : f32 to vector<16x256xf32>
    %8 = arith.maximumf %6, %7 : vector<16x256xf32>
    %9 = arith.truncf %8 : vector<16x256xf32> to vector<16x256xbf16>
    %c0_6 = arith.constant 0 : index
    %c0_7 = arith.constant 0 : index
    %10 = vector.load %arg4[%c0_6, %c0_7] : memref<256x256xbf16, #tpu.memory_space<vmem>>, vector<256x256xbf16>
    %cst_8 = arith.constant dense<0.000000e+00> : vector<16x256xf32>
    %11 = tpu.matmul %9, %10, %cst_8 {dimension_numbers = #tpu.dot_dimension_numbers<[1], [0], [0], [1], [0, 0, 1, 1], [], []>} : vector<16x256xbf16>, vector<256x256xbf16>, vector<16x256xf32> -> vector<16x256xf32>
    %c0_9 = arith.constant 0 : index
    %c0_10 = arith.constant 0 : index
    %12 = vector.load %arg5[%c0_9, %c0_10] : memref<1x256xf32, #tpu.memory_space<vmem>>, vector<1x256xf32>
    %13 = vector.broadcast %12 : vector<1x256xf32> to vector<16x256xf32>
    %14 = arith.addf %11, %13 : vector<16x256xf32>
    %cst_11 = arith.constant 0.000000e+00 : f32
    %15 = vector.broadcast %cst_11 : f32 to vector<16x256xf32>
    %16 = arith.subf %15, %14 : vector<16x256xf32>
    %17 = math.exp %16 : vector<16x256xf32>
    %cst_12 = arith.constant 1.000000e+00 : f32
    %18 = vector.broadcast %cst_12 : f32 to vector<16x256xf32>
    %19 = arith.addf %18, %17 : vector<16x256xf32>
    %20 = tpu.reciprocal %19 {approx = true} : vector<16x256xf32> -> vector<16x256xf32>
    %21 = arith.truncf %20 : vector<16x256xf32> to vector<16x256xbf16>
    %c0_13 = arith.constant 0 : index
    %c0_14 = arith.constant 0 : index
    %22 = vector.load %arg6[%c0_13, %c0_14] : memref<16x256xbf16, #tpu.memory_space<vmem>>, vector<16x256xbf16>
    tpu.vector_store %arg6[%c0_13, %c0_14], %21 {strides = array<i32>} : memref<16x256xbf16, #tpu.memory_space<vmem>>, vector<16x256xbf16>,
    return
  }
  func.func @transform_0(%arg0: i32) -> (i32, i32) {
    %c0_i32 = arith.constant 0 : i32
    %c0_i32_0 = arith.constant 0 : i32
    return %arg0, %c0_i32 : i32, i32
  }
  func.func @transform_1(%arg0: i32) -> (i32, i32) {
    %c0_i32 = arith.constant 0 : i32
    %c0_i32_0 = arith.constant 0 : i32
    %c0_i32_1 = arith.constant 0 : i32
    return %c0_i32, %c0_i32_0 : i32, i32
  }
  func.func @transform_2(%arg0: i32) -> (i32, i32) {
    %c0_i32 = arith.constant 0 : i32
    %c0_i32_0 = arith.constant 0 : i32
    %c0_i32_1 = arith.constant 0 : i32
    return %c0_i32, %c0_i32_0 : i32, i32
  }
  func.func @transform_3(%arg0: i32) -> (i32, i32) {
    %c0_i32 = arith.constant 0 : i32
    %c0_i32_0 = arith.constant 0 : i32
    %c0_i32_1 = arith.constant 0 : i32
    return %c0_i32, %c0_i32_0 : i32, i32
  }
  func.func @transform_4(%arg0: i32) -> (i32, i32) {
    %c0_i32 = arith.constant 0 : i32
    %c0_i32_0 = arith.constant 0 : i32
    %c0_i32_1 = arith.constant 0 : i32
    return %c0_i32, %c0_i32_0 : i32, i32
  }
  func.func @transform_5(%arg0: i32) -> (i32, i32) {
    %c0_i32 = arith.constant 0 : i32
    %c0_i32_0 = arith.constant 0 : i32
    return %arg0, %c0_i32 : i32, i32
  }
}

</mosaic_0001>

<bundles_post_ra>
// kernel: tpu_custom_call.1
= control target key start
LH: loop header
LB: loop body
LE: loop exit
PB: predicated region body
PF: predicated region fallthrough
CT: control target
= control target key end

     0   :  { %10 = vsyncpa [#allocation3], 0  ;;  %s959_s0 = inlined_call_operand.hbm [shape: f32[16,256], index: 0, kind: input, shape index: {}]   ;;  %s960_s1 = inlined_call_operand.hbm [shape: bf16[256,256], index: 1, kind: input, shape index: {}]   ;;  %s961_s2 = inlined_call_operand.vmem [shape: f32[1,256], index: 2, kind: input, shape index: {}]   ;;  %s962_s3 = inlined_call_operand.hbm [shape: bf16[256,256], index: 3, kind: input, shape index: {}]   ;;  %s963_s4 = inlined_call_operand.vmem [shape: f32[1,256], index: 4, kind: input, shape index: {}]   ;;  %s964_s5 = inlined_call_operand.hbm [shape: bf16[16,256], index: 5, kind: output, shape index: {}]  }
   0x1   :  { %11 = vsyncpa [#allocation6], 0 }
   0x2   :  { %12 = vsyncpa [#allocation4], 0  ;;  %s894_s18 = smov [#allocation5]  }
   0x3   :  { %s30_s19 = sshll.u32 %s894_s18, 4  ;;  %s31_s19 = int_to_ptr.vmem [resolvable:$true] %s30_s19 }
   0x4   :  { %s816_s20 = scalar_lea.vmem %s31_s19, 4096  ;;  %p821_p1 = scmp.lt.s32.totalorder %s31_s19, %s31_s19 }
   0x5   :  { %p817_p0 = scmp.ne.s32.totalorder %s31_s19, %s816_s20  ;;  %p822_p2 = scmp.lt.s32.totalorder %s816_s20, %s816_s20 }
   0x7   :  { %p823_p3 = por %p822_p2, %p821_p1 }
   0x9   :  { %p824_p4 = pnand %p823_p3, %p817_p0 }
   0xb   :  { %827 = shalt.err (!%p824_p4)
}
   0xc   :  { %s895_s21 = smov 128   ;;  %s896_s22 = smov 8  }
   0xd   :  { %36 = dma.hbm_to_vmem [thread:$0]  %s960_s1, 4096, %s31_s19, [#allocation6], %s895_s21, %s895_s21, %s896_s22  }
   0xe   :  { %s897_s25 = smov [#allocation2]  }
   0xf   :  { %s18_s26 = sshll.u32 %s897_s25, 4  ;;  %s19_s26 = int_to_ptr.vmem [resolvable:$true] %s18_s26 }
  0x10   :  { %s836_s27 = scalar_lea.vmem %s19_s26, 512  ;;  %p841_p6 = scmp.lt.s32.totalorder %s19_s26, %s19_s26 }
  0x11   :  { %p837_p5 = scmp.ne.s32.totalorder %s19_s26, %s836_s27  ;;  %p842_p7 = scmp.lt.s32.totalorder %s836_s27, %s836_s27 }
  0x13   :  { %p843_p8 = por %p842_p7, %p841_p6 }
  0x15   :  { %p844_p9 = pnand %p843_p8, %p837_p5 }
  0x17   :  { %847 = shalt.err (!%p844_p9)
}
  0x18   :  { %s898_s28 = smov 256   ;;  %s899_s29 = smov 16  }
  0x19   :  { %24 = dma.hbm_to_vmem [thread:$0]  %s959_s0, 512, %s19_s26, [#allocation3], %s898_s28, %s898_s28, %s899_s29  }
  0x1a   :  { %s900_s7 = smov [#allocation7]  }
  0x1b   :  { %s44_s8 = sshll.u32 %s900_s7, 4  ;;  %s45_s8 = int_to_ptr.vmem [resolvable:$true] %s44_s8 }
  0x1c   :  { %s856_s1 = scalar_lea.vmem %s45_s8, 4096  ;;  %p861_p11 = scmp.lt.s32.totalorder %s45_s8, %s45_s8 }
  0x1d   :  { %p857_p10 = scmp.ne.s32.totalorder %s45_s8, %s856_s1  ;;  %p862_p12 = scmp.lt.s32.totalorder %s856_s1, %s856_s1 }
  0x1f   :  { %p863_p13 = por %p862_p12, %p861_p11 }
  0x21   :  { %p864_p0 = pnand %p863_p13, %p857_p10 }
  0x23   :  { %867 = shalt.err (!%p864_p0)
}
  0x24   :  { %50 = dma.hbm_to_vmem [thread:$0]  %s962_s3, 4096, %s45_s8, [#allocation6], %s895_s21, %s895_s21, %s896_s22  }
  0x25   :  { %888 = dma.done.wait [#allocation3], 512  }
  0x26   :  { %889 = vsyncadd [#allocation3], 4294966784 }
  0x27   :  { %890 = dma.done.wait [#allocation6], 8192  }
  0x28   :  { %891 = vsyncadd [#allocation6], 4294959104  ;;  %v696_v0 = vld [vmem:[#allocation5 + $0x74] ss:$8 sps:$4 sm:$0xff]   ;;  %v698_v1 = vld [vmem:[#allocation5 + $0x70] ss:$8 sps:$4 sm:$0xff]  }
  0x29   :  { %272 = vmatprep.subr.bf16.mxu0 %v696_v0  ;;  %v699_v2 = vld [vmem:[#allocation5 + $0x64] ss:$8 sps:$4 sm:$0xff]   ;;  %v701_v3 = vld [vmem:[#allocation5 + $0x60] ss:$8 sps:$4 sm:$0xff]   ;;  %v702_v4 = vld [vmem:[#allocation5 + $0x54] ss:$8 sps:$4 sm:$0xff]  }
  0x2a   :  { %273 = vmatpush1.bf16.msra.mxu0 %v698_v1  ;;  %v704_v5 = vld [vmem:[#allocation5 + $0x50] ss:$8 sps:$4 sm:$0xff]   ;;  %v705_v6 = vld [vmem:[#allocation5 + $0x44] ss:$8 sps:$4 sm:$0xff]   ;;  %v707_v7 = vld [vmem:[#allocation5 + $0x40] ss:$8 sps:$4 sm:$0xff]  }
  0x2b   :  { %274 = vmatprep.subr.bf16.mxu0 %v699_v2  ;;  %v708_v8 = vld [vmem:[#allocation5 + $0x34] ss:$8 sps:$4 sm:$0xff]   ;;  %v710_v9 = vld [vmem:[#allocation5 + $0x30] ss:$8 sps:$4 sm:$0xff]   ;;  %v711_v10 = vld [vmem:[#allocation5 + $0x24] ss:$8 sps:$4 sm:$0xff]  }
  0x2c   :  { %v713_v11 = vld [vmem:[#allocation5 + $0x20] ss:$8 sps:$4 sm:$0xff]   ;;  %v714_v12 = vld [vmem:[#allocation5 + $0x14] ss:$8 sps:$4 sm:$0xff]   ;;  %v716_v15 = vld [vmem:[#allocation5 + $0x10] ss:$8 sps:$4 sm:$0xff]  }
  0x2d   :  { %v63_v13 = vld [vmem:[#allocation2 + $0x8] sm:$0xff]  ;;  %v65_v14 = vld [vmem:[#allocation2 + $0x18] sm:$0xff]  ;;  %v62_v55 = vld [vmem:[#allocation2] sm:$0xff] }
  0x2e   :  { %275 = vmatpush1.bf16.msra.mxu0 %v701_v3  ;;  %v717_v16 = vld [vmem:[#allocation5 + $0x4] ss:$8 sps:$4 sm:$0xff]   ;;  %v67_v17 = vpack.c.bf16 %v65_v14, %v63_v13  ;;  %v744_v18 = vld [vmem:[#allocation7 + $0x74] ss:$8 sps:$4 sm:$0xff]   ;;  %v746_v19 = vld [vmem:[#allocation7 + $0x70] ss:$8 sps:$4 sm:$0xff]  }
  0x2f   :  { %276 = vmatprep.subr.bf16.mxu0 %v702_v4  ;;  %v747_v20 = vld [vmem:[#allocation7 + $0x64] ss:$8 sps:$4 sm:$0xff]   ;;  %525 = vmatprep.subr.bf16.mxu1 %v744_v18  ;;  %v749_v21 = vld [vmem:[#allocation7 + $0x60] ss:$8 sps:$4 sm:$0xff]   ;;  %v750_v23 = vld [vmem:[#allocation7 + $0x54] ss:$8 sps:$4 sm:$0xff]  }
  0x30   :  { %304 = vmatprep.mubr.bf16.mxu0 %v67_v17  ;;  %526 = vmatpush1.bf16.msra.mxu1 %v746_v19  ;;  %v719_v22 = vld [vmem:[#allocation5] ss:$8 sps:$4 sm:$0xff]   ;;  %v720_v24 = vld [vmem:[#allocation5 + $0xf4] ss:$8 sps:$4 sm:$0xff]   ;;  %v752_v25 = vld [vmem:[#allocation7 + $0x50] ss:$8 sps:$4 sm:$0xff]  }
  0x31   :  { %527 = vmatprep.subr.bf16.mxu1 %v747_v20  ;;  %v722_v26 = vld [vmem:[#allocation5 + $0xf0] ss:$8 sps:$4 sm:$0xff]   ;;  %v753_v27 = vld [vmem:[#allocation7 + $0x44] ss:$8 sps:$4 sm:$0xff]   ;;  %v755_v29 = vld [vmem:[#allocation7 + $0x40] ss:$8 sps:$4 sm:$0xff]  }
  0x32   :  { %277 = vmatpush1.bf16.msra.mxu0 %v704_v5  ;;  %v723_v28 = vld [vmem:[#allocation5 + $0xe4] ss:$8 sps:$4 sm:$0xff]   ;;  %v725_v30 = vld [vmem:[#allocation5 + $0xe0] ss:$8 sps:$4 sm:$0xff]   ;;  %v756_v31 = vld [vmem:[#allocation7 + $0x34] ss:$8 sps:$4 sm:$0xff]  }
  0x33   :  { %278 = vmatprep.subr.bf16.mxu0 %v705_v6  ;;  %v726_v32 = vld [vmem:[#allocation5 + $0xd4] ss:$8 sps:$4 sm:$0xff]   ;;  %v758_v33 = vld [vmem:[#allocation7 + $0x30] ss:$8 sps:$4 sm:$0xff]   ;;  %v759_v35 = vld [vmem:[#allocation7 + $0x24] ss:$8 sps:$4 sm:$0xff]   ;;  %v102_v6 = vlaneseq }
  0x34   :  { %528 = vmatpush1.bf16.msra.mxu1 %v749_v21  ;;  %v728_v34 = vld [vmem:[#allocation5 + $0xd0] ss:$8 sps:$4 sm:$0xff]   ;;  %v729_v36 = vld [vmem:[#allocation5 + $0xc4] ss:$8 sps:$4 sm:$0xff]   ;;  %v761_v37 = vld [vmem:[#allocation7 + $0x20] ss:$8 sps:$4 sm:$0xff]  }
  0x35   :  { %529 = vmatprep.subr.bf16.mxu1 %v750_v23  ;;  %v731_v38 = vld [vmem:[#allocation5 + $0xc0] ss:$8 sps:$4 sm:$0xff]   ;;  %v762_v39 = vld [vmem:[#allocation7 + $0x14] ss:$8 sps:$4 sm:$0xff]   ;;  %v764_v41 = vld [vmem:[#allocation7 + $0x10] ss:$8 sps:$4 sm:$0xff]  }
  0x36   :  { %279 = vmatpush1.bf16.msra.mxu0 %v707_v7  ;;  %v732_v40 = vld [vmem:[#allocation5 + $0xb4] ss:$8 sps:$4 sm:$0xff]   ;;  %v734_v42 = vld [vmem:[#allocation5 + $0xb0] ss:$8 sps:$4 sm:$0xff]   ;;  %v765_v43 = vld [vmem:[#allocation7 + $0x4] ss:$8 sps:$4 sm:$0xff]  }
  0x37   :  { %280 = vmatprep.subr.bf16.mxu0 %v708_v8  ;;  %v735_v44 = vld [vmem:[#allocation5 + $0xa4] ss:$8 sps:$4 sm:$0xff]   ;;  %v767_v45 = vld [vmem:[#allocation7] ss:$8 sps:$4 sm:$0xff]   ;;  %v768_v47 = vld [vmem:[#allocation7 + $0xf4] ss:$8 sps:$4 sm:$0xff]  }
  0x38   :  { %530 = vmatpush1.bf16.msra.mxu1 %v752_v25  ;;  %v737_v46 = vld [vmem:[#allocation5 + $0xa0] ss:$8 sps:$4 sm:$0xff]   ;;  %v738_v48 = vld [vmem:[#allocation5 + $0x94] ss:$8 sps:$4 sm:$0xff]   ;;  %v770_v49 = vld [vmem:[#allocation7 + $0xf0] ss:$8 sps:$4 sm:$0xff]  }
  0x39   :  { %531 = vmatprep.subr.bf16.mxu1 %v753_v27  ;;  %v740_v50 = vld [vmem:[#allocation5 + $0x90] ss:$8 sps:$4 sm:$0xff]   ;;  %v771_v51 = vld [vmem:[#allocation7 + $0xe4] ss:$8 sps:$4 sm:$0xff]   ;;  %v743_v53 = vld [vmem:[#allocation5 + $0x80] ss:$8 sps:$4 sm:$0xff]  }
  0x3a   :  { %281 = vmatpush1.bf16.msra.mxu0 %v710_v9  ;;  %v741_v52 = vld [vmem:[#allocation5 + $0x84] ss:$8 sps:$4 sm:$0xff]   ;;  %v773_v54 = vld [vmem:[#allocation7 + $0xe0] ss:$8 sps:$4 sm:$0xff]   ;;  %v64_v56 = vld [vmem:[#allocation2 + $0x10] sm:$0xff]  ;;  %v103_v7 = vshrl.u32 %v102_v6, 7 }
  0x3b   :  { %282 = vmatprep.subr.bf16.mxu0 %v711_v10  ;;  %v774_v57 = vld [vmem:[#allocation7 + $0xd4] ss:$8 sps:$4 sm:$0xff]   ;;  %v66_v58 = vpack.c.bf16 %v64_v56, %v62_v55  ;;  %v776_v59 = vld [vmem:[#allocation7 + $0xd0] ss:$8 sps:$4 sm:$0xff]   ;;  %v777_v60 = vld [vmem:[#allocation7 + $0xc4] ss:$8 sps:$4 sm:$0xff]  }
  0x3c   :  { %532 = vmatpush1.bf16.msra.mxu1 %v755_v29  ;;  %v779_v61 = vld [vmem:[#allocation7 + $0xc0] ss:$8 sps:$4 sm:$0xff]   ;;  %v780_v62 = vld [vmem:[#allocation7 + $0xb4] ss:$8 sps:$4 sm:$0xff]   ;;  %v782_v63 = vld [vmem:[#allocation7 + $0xb0] ss:$8 sps:$4 sm:$0xff]  }
  0x3d   :  { %533 = vmatprep.subr.bf16.mxu1 %v756_v31  ;;  %v783_v0 = vld [vmem:[#allocation7 + $0xa4] ss:$8 sps:$4 sm:$0xff]   ;;  %v785_v1 = vld [vmem:[#allocation7 + $0xa0] ss:$8 sps:$4 sm:$0xff]   ;;  %v786_v2 = vld [vmem:[#allocation7 + $0x94] ss:$8 sps:$4 sm:$0xff]  }
  0x3e   :  { %283 = vmatpush1.bf16.msra.mxu0 %v713_v11  ;;  %v788_v3 = vld [vmem:[#allocation7 + $0x90] ss:$8 sps:$4 sm:$0xff]   ;;  %v789_v4 = vld [vmem:[#allocation7 + $0x84] ss:$8 sps:$4 sm:$0xff]   ;;  %v791_v5 = vld [vmem:[#allocation7 + $0x80] ss:$8 sps:$4 sm:$0xff]  }
  0x3f   :  { %284 = vmatprep.subr.bf16.mxu0 %v714_v12  ;;  %v108_v8 = vsub.s32 1, %v103_v7  ;;  %v104_v9 = vsub.s32 0, %v103_v7  ;;  %v100_v10 = vld [vmem:[%s961_s2] sm:$0x3] }
  0x40   :  { %534 = vmatpush1.bf16.msra.mxu1 %v758_v33  ;;  %v353_v27 = vld [vmem:[%s963_s4] sm:$0x3]  ;;  %s901_s4 = smov [#allocation8]  }
  0x41   :  { %535 = vmatprep.subr.bf16.mxu1 %v759_v35  ;;  %v109_v12 = vrot.slane %v100_v10, %v108_v8  ;;  %v105_v13 = vrot.slane %v100_v10, %v104_v9  ;;  %v362_v29 = vrot.slane %v353_v27, %v108_v8  ;;  %s607_s12 = sshll.u32 %s901_s4, 4  ;;  %s608_s12 = int_to_ptr.vmem [resolvable:$true] %s607_s12 }
  0x42   :  { %285 = vmatpush1.bf16.msra.mxu0 %v716_v15  ;;  %s868_s13 = scalar_lea.vmem %s608_s12, 256  ;;  %p873_p2 = scmp.lt.s32.totalorder %s608_s12, %s608_s12 }
  0x43   :  { %286 = vmatprep.subr.bf16.mxu0 %v717_v16  ;;  %p869_p1 = scmp.ne.s32.totalorder %s608_s12, %s868_s13  ;;  %p874_p3 = scmp.lt.s32.totalorder %s868_s13, %s868_s13 }
  0x44   :  { %536 = vmatpush1.bf16.msra.mxu1 %v761_v37 }
  0x45   :  { %537 = vmatprep.subr.bf16.mxu1 %v762_v39  ;;  %p875_p4 = por %p874_p3, %p873_p2 }
  0x46   :  { %287 = vmatpush1.bf16.msra.mxu0 %v719_v22 }
  0x47   :  { %288 = vmatprep.subr.bf16.mxu0 %v720_v24  ;;  %p876_p5 = pnand %p875_p4, %p869_p1 }
  0x48   :  { %538 = vmatpush1.bf16.msra.mxu1 %v764_v41 }
  0x49   :  { %539 = vmatprep.subr.bf16.mxu1 %v765_v43 }
  0x4a   :  { %289 = vmatpush2.bf16.msra.mxu0 %v722_v26 }
  0x4b   :  { %290 = vmatprep.subr.bf16.mxu0 %v723_v28  ;;  %v358_v28 = vrot.slane %v353_v27, %v104_v9 }
  0x4c   :  { %540 = vmatpush1.bf16.msra.mxu1 %v767_v45 }
  0x4d   :  { %541 = vmatprep.subr.bf16.mxu1 %v768_v47 }
  0x4e   :  { %291 = vmatpush2.bf16.msra.mxu0 %v725_v30 }
  0x4f   :  { %292 = vmatprep.subr.bf16.mxu0 %v726_v32 }
  0x50   :  { %542 = vmatpush2.bf16.msra.mxu1 %v770_v49 }
  0x51   :  { %543 = vmatprep.subr.bf16.mxu1 %v771_v51 }
  0x52   :  { %293 = vmatpush2.bf16.msra.mxu0 %v728_v34 }
  0x53   :  { %294 = vmatprep.subr.bf16.mxu0 %v729_v36 }
  0x54   :  { %544 = vmatpush2.bf16.msra.mxu1 %v773_v54 }
  0x55   :  { %545 = vmatprep.subr.bf16.mxu1 %v774_v57 }
  0x56   :  { %295 = vmatpush2.bf16.msra.mxu0 %v731_v38 }
  0x57   :  { %296 = vmatprep.subr.bf16.mxu0 %v732_v40 }
  0x58   :  { %546 = vmatpush2.bf16.msra.mxu1 %v776_v59 }
  0x59   :  { %547 = vmatprep.subr.bf16.mxu1 %v777_v60 }
  0x5a   :  { %297 = vmatpush2.bf16.msra.mxu0 %v734_v42 }
  0x5b   :  { %298 = vmatprep.subr.bf16.mxu0 %v735_v44 }
  0x5c   :  { %548 = vmatpush2.bf16.msra.mxu1 %v779_v61 }
  0x5d   :  { %549 = vmatprep.subr.bf16.mxu1 %v780_v62 }
  0x5e   :  { %299 = vmatpush2.bf16.msra.mxu0 %v737_v46 }
  0x5f   :  { %300 = vmatprep.subr.bf16.mxu0 %v738_v48 }
  0x60   :  { %550 = vmatpush2.bf16.msra.mxu1 %v782_v63 }
  0x61   :  { %551 = vmatprep.subr.bf16.mxu1 %v783_v0 }
  0x62   :  { %301 = vmatpush2.bf16.msra.mxu0 %v740_v50 }
  0x63   :  { %302 = vmatprep.subr.bf16.mxu0 %v741_v52 }
  0x64   :  { %552 = vmatpush2.bf16.msra.mxu1 %v785_v1 }
  0x65   :  { %553 = vmatprep.subr.bf16.mxu1 %v786_v2 }
  0x66   :  { %303 = vmatpush2.bf16.msra.mxu0 %v743_v53 }
  0x68   :  { %554 = vmatpush2.bf16.msra.mxu1 %v788_v3 }
  0x69   :  { %305 = vmatmul.mubr.bf16.vlgmr.msra.gmra.mxu0 %v66_v58  ;;  %555 = vmatprep.subr.bf16.mxu1 %v789_v4 }
  0x6c   :  { %556 = vmatpush2.bf16.msra.mxu1 %v791_v5 }
 0x129   :  { %v306_v11 = vpop.f32.mrf.mxu0 }
 0x12a   :  { %v307_v18 = vadd.f32 %v306_v11, %v105_v13 }
 0x12b   :  { %v308_v14 = vpop.f32.mrf.mxu0 }
 0x12c   :  { %v309_v16 = vadd.f32 %v308_v14, %v109_v12  ;;  %v315_v24 = vmax.f32 %v307_v18, 0.0 }
 0x12d   :  { %v310_v15 = vpop.f32.mrf.mxu0 }
 0x12e   :  { %v311_v17 = vadd.f32 %v310_v15, %v105_v13  ;;  %v316_v22 = vmax.f32 %v309_v16, 0.0 }
 0x12f   :  { %v312_v19 = vpop.f32.mrf.mxu0 }
 0x130   :  { %v313_v20 = vadd.f32 %v312_v19, %v109_v12  ;;  %v317_v21 = vmax.f32 %v311_v17, 0.0 }
 0x132   :  { %v318_v23 = vmax.f32 %v313_v20, 0.0  ;;  %v319_v26 = vpack.c.bf16 %v317_v21, %v315_v24 }
 0x134   :  { %v320_v25 = vpack.c.bf16 %v318_v23, %v316_v22 }
 0x136   :  { %557 = vmatprep.mubr.bf16.mxu1 %v320_v25 }
 0x137   :  { %558 = vmatmul.mubr.bf16.vlgmr.msra.gmra.mxu1 %v319_v26 }
 0x1f7   :  { %v559_v30 = vpop.f32.mrf.mxu1 }
 0x1f8   :  { %v560_v31 = vadd.f32 %v559_v30, %v358_v28 }
 0x1f9   :  { %v561_v32 = vpop.f32.mrf.mxu1 }
 0x1fa   :  { %v568_v33 = vsub.f32 0.0, %v560_v31  ;;  %v562_v34 = vadd.f32 %v561_v32, %v362_v29 }
 0x1fb   :  { %v563_v35 = vpop.f32.mrf.mxu1 }
 0x1fc   :  { %v572_v36 = vmul.f32 1.442695, %v568_v33  ;;  %v569_v37 = vsub.f32 0.0, %v562_v34  ;;  %v564_v38 = vadd.f32 %v563_v35, %v358_v28 }
 0x1fd   :  { %v565_v39 = vpop.f32.mrf.mxu1 }
 0x1fe   :  { %792 = vpow2.f32 %v572_v36  ;;  %v574_v40 = vmul.f32 1.442695, %v569_v37  ;;  %v570_v41 = vsub.f32 0.0, %v564_v38  ;;  %v566_v42 = vadd.f32 %v565_v39, %v362_v29 }
 0x200   :  { %794 = vpow2.f32 %v574_v40  ;;  %v576_v43 = vmul.f32 1.442695, %v570_v41  ;;  %v571_v44 = vsub.f32 0.0, %v566_v42 }
 0x202   :  { %796 = vpow2.f32 %v576_v43  ;;  %v578_v45 = vmul.f32 1.442695, %v571_v44 }
 0x204   :  { %798 = vpow2.f32 %v578_v45 }
 0x20b   :  { %v793_v46 = vpop.eup %792 }
 0x20c   :  { %v580_v47 = vadd.f32 1.0, %v793_v46 }
 0x20d   :  { %v795_v48 = vpop.eup %794 }
 0x20e   :  { %v581_v49 = vadd.f32 1.0, %v795_v48  ;;  %800 = vrcp.f32 %v580_v47 }
 0x20f   :  { %v797_v50 = vpop.eup %796 }
 0x210   :  { %802 = vrcp.f32 %v581_v49  ;;  %v582_v51 = vadd.f32 1.0, %v797_v50 }
 0x211   :  { %v799_v52 = vpop.eup %798 }
 0x212   :  { %v583_v53 = vadd.f32 1.0, %v799_v52  ;;  %804 = vrcp.f32 %v582_v51 }
 0x214   :  { %806 = vrcp.f32 %v583_v53 }
 0x21b   :  { %v801_v54 = vpop.eup %800 }
 0x21d   :  { %v803_v55 = vpop.eup %802 }
 0x21e   :  { %v686_v56 = vpack.c.bf16 %v803_v55, %v801_v54 }
 0x21f   :  { %v805_v57 = vpop.eup %804 }
 0x220   :  { %600 = vst [vmem:[#allocation8] sm:$0xff] %v686_v56 }
 0x221   :  { %v807_v58 = vpop.eup %806 }
 0x222   :  { %v687_v59 = vpack.c.bf16 %v807_v58, %v805_v57 }
 0x224   :  { %601 = vst [vmem:[#allocation8 + $0x8] sm:$0xff] %v687_v59 }
 0x225   :  { %879 = shalt.err (!%p876_p5)
}
 0x226   :  { %613 = dma.vmem_to_hbm [thread:$0]  %s608_s12, 256, %s964_s5, [#allocation4], %s895_s21, %s895_s21, %s896_s22  }
 0x227   :  { %892 = dma.done.wait [#allocation4], 256  }
 0x228   :  { %893 = vsyncadd [#allocation4], 4294967040 }
 0x229   :  { %617 = vsyncpa [#allocation3], 1 }
 0x22a   :  { %618 = vsyncpa [#allocation6], 1 }
 0x22b   :  { %619 = vsyncpa [#allocation4], 1 }

// kernel: tpu_custom_call.1
= control target key start
LH: loop header
LB: loop body
LE: loop exit
PB: predicated region body
PF: predicated region fallthrough
CT: control target
= control target key end

     0   :  { %10 = vsyncpa [#allocation3], 0  ;;  %s959_s0 = inlined_call_operand.hbm [shape: f32[16,256], index: 0, kind: input, shape index: {}]   ;;  %s960_s1 = inlined_call_operand.hbm [shape: bf16[256,256], index: 1, kind: input, shape index: {}]   ;;  %s961_s2 = inlined_call_operand.vmem [shape: f32[1,256], index: 2, kind: input, shape index: {}]   ;;  %s962_s3 = inlined_call_operand.hbm [shape: bf16[256,256], index: 3, kind: input, shape index: {}]   ;;  %s963_s4 = inlined_call_operand.vmem [shape: f32[1,256], index: 4, kind: input, shape index: {}]   ;;  %s964_s5 = inlined_call_operand.hbm [shape: bf16[16,256], index: 5, kind: output, shape index: {}]  }
   0x1   :  { %11 = vsyncpa [#allocation6], 0 }
   0x2   :  { %12 = vsyncpa [#allocation4], 0  ;;  %s894_s18 = smov [#allocation5]  }
   0x3   :  { %s30_s19 = sshll.u32 %s894_s18, 4  ;;  %s31_s19 = int_to_ptr.vmem [resolvable:$true] %s30_s19 }
   0x4   :  { %s816_s20 = scalar_lea.vmem %s31_s19, 4096  ;;  %p821_p1 = scmp.lt.s32.totalorder %s31_s19, %s31_s19 }
   0x5   :  { %p817_p0 = scmp.ne.s32.totalorder %s31_s19, %s816_s20  ;;  %p822_p2 = scmp.lt.s32.totalorder %s816_s20, %s816_s20 }
   0x7   :  { %p823_p3 = por %p822_p2, %p821_p1 }
   0x9   :  { %p824_p4 = pnand %p823_p3, %p817_p0 }
   0xb   :  { %827 = shalt.err (!%p824_p4)
}
   0xc   :  { %s895_s21 = smov 128   ;;  %s896_s22 = smov 8  }
   0xd   :  { %36 = dma.hbm_to_vmem [thread:$0]  %s960_s1, 4096, %s31_s19, [#allocation6], %s895_s21, %s895_s21, %s896_s22  }
   0xe   :  { %s897_s25 = smov [#allocation2]  }
   0xf   :  { %s18_s26 = sshll.u32 %s897_s25, 4  ;;  %s19_s26 = int_to_ptr.vmem [resolvable:$true] %s18_s26 }
  0x10   :  { %s836_s27 = scalar_lea.vmem %s19_s26, 512  ;;  %p841_p6 = scmp.lt.s32.totalorder %s19_s26, %s19_s26 }
  0x11   :  { %p837_p5 = scmp.ne.s32.totalorder %s19_s26, %s836_s27  ;;  %p842_p7 = scmp.lt.s32.totalorder %s836_s27, %s836_s27 }
  0x13   :  { %p843_p8 = por %p842_p7, %p841_p6 }
  0x15   :  { %p844_p9 = pnand %p843_p8, %p837_p5 }
  0x17   :  { %847 = shalt.err (!%p844_p9)
}
  0x18   :  { %s898_s28 = smov 256   ;;  %s899_s29 = smov 16  }
  0x19   :  { %24 = dma.hbm_to_vmem [thread:$0]  %s959_s0, 512, %s19_s26, [#allocation3], %s898_s28, %s898_s28, %s899_s29  }
  0x1a   :  { %s900_s7 = smov [#allocation7]  }
  0x1b   :  { %s44_s8 = sshll.u32 %s900_s7, 4  ;;  %s45_s8 = int_to_ptr.vmem [resolvable:$true] %s44_s8 }
  0x1c   :  { %s856_s1 = scalar_lea.vmem %s45_s8, 4096  ;;  %p861_p11 = scmp.lt.s32.totalorder %s45_s8, %s45_s8 }
  0x1d   :  { %p857_p10 = scmp.ne.s32.totalorder %s45_s8, %s856_s1  ;;  %p862_p12 = scmp.lt.s32.totalorder %s856_s1, %s856_s1 }
  0x1f   :  { %p863_p13 = por %p862_p12, %p861_p11 }
  0x21   :  { %p864_p0 = pnand %p863_p13, %p857_p10 }
  0x23   :  { %867 = shalt.err (!%p864_p0)
}
  0x24   :  { %50 = dma.hbm_to_vmem [thread:$0]  %s962_s3, 4096, %s45_s8, [#allocation6], %s895_s21, %s895_s21, %s896_s22  }
  0x25   :  { %888 = dma.done.wait [#allocation3], 512  }
  0x26   :  { %889 = vsyncadd [#allocation3], 4294966784 }
  0x27   :  { %890 = dma.done.wait [#allocation6], 8192  }
  0x28   :  { %891 = vsyncadd [#allocation6], 4294959104  ;;  %v696_v0 = vld [vmem:[#allocation5 + $0x74] ss:$8 sps:$4 sm:$0xff]   ;;  %v698_v1 = vld [vmem:[#allocation5 + $0x70] ss:$8 sps:$4 sm:$0xff]  }
  0x29   :  { %272 = vmatprep.subr.bf16.mxu0 %v696_v0  ;;  %v699_v2 = vld [vmem:[#allocation5 + $0x64] ss:$8 sps:$4 sm:$0xff]   ;;  %v701_v3 = vld [vmem:[#allocation5 + $0x60] ss:$8 sps:$4 sm:$0xff]   ;;  %v702_v4 = vld [vmem:[#allocation5 + $0x54] ss:$8 sps:$4 sm:$0xff]  }
  0x2a   :  { %273 = vmatpush1.bf16.msra.mxu0 %v698_v1  ;;  %v704_v5 = vld [vmem:[#allocation5 + $0x50] ss:$8 sps:$4 sm:$0xff]   ;;  %v705_v6 = vld [vmem:[#allocation5 + $0x44] ss:$8 sps:$4 sm:$0xff]   ;;  %v707_v7 = vld [vmem:[#allocation5 + $0x40] ss:$8 sps:$4 sm:$0xff]  }
  0x2b   :  { %274 = vmatprep.subr.bf16.mxu0 %v699_v2  ;;  %v708_v8 = vld [vmem:[#allocation5 + $0x34] ss:$8 sps:$4 sm:$0xff]   ;;  %v710_v9 = vld [vmem:[#allocation5 + $0x30] ss:$8 sps:$4 sm:$0xff]   ;;  %v711_v10 = vld [vmem:[#allocation5 + $0x24] ss:$8 sps:$4 sm:$0xff]  }
  0x2c   :  { %v713_v11 = vld [vmem:[#allocation5 + $0x20] ss:$8 sps:$4 sm:$0xff]   ;;  %v714_v12 = vld [vmem:[#allocation5 + $0x14] ss:$8 sps:$4 sm:$0xff]   ;;  %v716_v15 = vld [vmem:[#allocation5 + $0x10] ss:$8 sps:$4 sm:$0xff]  }
  0x2d   :  { %v63_v13 = vld [vmem:[#allocation2 + $0x8] sm:$0xff]  ;;  %v65_v14 = vld [vmem:[#allocation2 + $0x18] sm:$0xff]  ;;  %v62_v55 = vld [vmem:[#allocation2] sm:$0xff] }
  0x2e   :  { %275 = vmatpush1.bf16.msra.mxu0 %v701_v3  ;;  %v717_v16 = vld [vmem:[#allocation5 + $0x4] ss:$8 sps:$4 sm:$0xff]   ;;  %v67_v17 = vpack.c.bf16 %v65_v14, %v63_v13  ;;  %v744_v18 = vld [vmem:[#allocation7 + $0x74] ss:$8 sps:$4 sm:$0xff]   ;;  %v746_v19 = vld [vmem:[#allocation7 + $0x70] ss:$8 sps:$4 sm:$0xff]  }
  0x2f   :  { %276 = vmatprep.subr.bf16.mxu0 %v702_v4  ;;  %v747_v20 = vld [vmem:[#allocation7 + $0x64] ss:$8 sps:$4 sm:$0xff]   ;;  %525 = vmatprep.subr.bf16.mxu1 %v744_v18  ;;  %v749_v21 = vld [vmem:[#allocation7 + $0x60] ss:$8 sps:$4 sm:$0xff]   ;;  %v750_v23 = vld [vmem:[#allocation7 + $0x54] ss:$8 sps:$4 sm:$0xff]  }
  0x30   :  { %304 = vmatprep.mubr.bf16.mxu0 %v67_v17  ;;  %526 = vmatpush1.bf16.msra.mxu1 %v746_v19  ;;  %v719_v22 = vld [vmem:[#allocation5] ss:$8 sps:$4 sm:$0xff]   ;;  %v720_v24 = vld [vmem:[#allocation5 + $0xf4] ss:$8 sps:$4 sm:$0xff]   ;;  %v752_v25 = vld [vmem:[#allocation7 + $0x50] ss:$8 sps:$4 sm:$0xff]  }
  0x31   :  { %527 = vmatprep.subr.bf16.mxu1 %v747_v20  ;;  %v722_v26 = vld [vmem:[#allocation5 + $0xf0] ss:$8 sps:$4 sm:$0xff]   ;;  %v753_v27 = vld [vmem:[#allocation7 + $0x44] ss:$8 sps:$4 sm:$0xff]   ;;  %v755_v29 = vld [vmem:[#allocation7 + $0x40] ss:$8 sps:$4 sm:$0xff]  }
  0x32   :  { %277 = vmatpush1.bf16.msra.mxu0 %v704_v5  ;;  %v723_v28 = vld [vmem:[#allocation5 + $0xe4] ss:$8 sps:$4 sm:$0xff]   ;;  %v725_v30 = vld [vmem:[#allocation5 + $0xe0] ss:$8 sps:$4 sm:$0xff]   ;;  %v756_v31 = vld [vmem:[#allocation7 + $0x34] ss:$8 sps:$4 sm:$0xff]  }
  0x33   :  { %278 = vmatprep.subr.bf16.mxu0 %v705_v6  ;;  %v726_v32 = vld [vmem:[#allocation5 + $0xd4] ss:$8 sps:$4 sm:$0xff]   ;;  %v758_v33 = vld [vmem:[#allocation7 + $0x30] ss:$8 sps:$4 sm:$0xff]   ;;  %v759_v35 = vld [vmem:[#allocation7 + $0x24] ss:$8 sps:$4 sm:$0xff]   ;;  %v102_v6 = vlaneseq }
  0x34   :  { %528 = vmatpush1.bf16.msra.mxu1 %v749_v21  ;;  %v728_v34 = vld [vmem:[#allocation5 + $0xd0] ss:$8 sps:$4 sm:$0xff]   ;;  %v729_v36 = vld [vmem:[#allocation5 + $0xc4] ss:$8 sps:$4 sm:$0xff]   ;;  %v761_v37 = vld [vmem:[#allocation7 + $0x20] ss:$8 sps:$4 sm:$0xff]  }
  0x35   :  { %529 = vmatprep.subr.bf16.mxu1 %v750_v23  ;;  %v731_v38 = vld [vmem:[#allocation5 + $0xc0] ss:$8 sps:$4 sm:$0xff]   ;;  %v762_v39 = vld [vmem:[#allocation7 + $0x14] ss:$8 sps:$4 sm:$0xff]   ;;  %v764_v41 = vld [vmem:[#allocation7 + $0x10] ss:$8 sps:$4 sm:$0xff]  }
  0x36   :  { %279 = vmatpush1.bf16.msra.mxu0 %v707_v7  ;;  %v732_v40 = vld [vmem:[#allocation5 + $0xb4] ss:$8 sps:$4 sm:$0xff]   ;;  %v734_v42 = vld [vmem:[#allocation5 + $0xb0] ss:$8 sps:$4 sm:$0xff]   ;;  %v765_v43 = vld [vmem:[#allocation7 + $0x4] ss:$8 sps:$4 sm:$0xff]  }
  0x37   :  { %280 = vmatprep.subr.bf16.mxu0 %v708_v8  ;;  %v735_v44 = vld [vmem:[#allocation5 + $0xa4] ss:$8 sps:$4 sm:$0xff]   ;;  %v767_v45 = vld [vmem:[#allocation7] ss:$8 sps:$4 sm:$0xff]   ;;  %v768_v47 = vld [vmem:[#allocation7 + $0xf4] ss:$8 sps:$4 sm:$0xff]  }
  0x38   :  { %530 = vmatpush1.bf16.msra.mxu1 %v752_v25  ;;  %v737_v46 = vld [vmem:[#allocation5 + $0xa0] ss:$8 sps:$4 sm:$0xff]   ;;  %v738_v48 = vld [vmem:[#allocation5 + $0x94] ss:$8 sps:$4 sm:$0xff]   ;;  %v770_v49 = vld [vmem:[#allocation7 + $0xf0] ss:$8 sps:$4 sm:$0xff]  }
  0x39   :  { %531 = vmatprep.subr.bf16.mxu1 %v753_v27  ;;  %v740_v50 = vld [vmem:[#allocation5 + $0x90] ss:$8 sps:$4 sm:$0xff]   ;;  %v771_v51 = vld [vmem:[#allocation7 + $0xe4] ss:$8 sps:$4 sm:$0xff]   ;;  %v743_v53 = vld [vmem:[#allocation5 + $0x80] ss:$8 sps:$4 sm:$0xff]  }
  0x3a   :  { %281 = vmatpush1.bf16.msra.mxu0 %v710_v9  ;;  %v741_v52 = vld [vmem:[#allocation5 + $0x84] ss:$8 sps:$4 sm:$0xff]   ;;  %v773_v54 = vld [vmem:[#allocation7 + $0xe0] ss:$8 sps:$4 sm:$0xff]   ;;  %v64_v56 = vld [vmem:[#allocation2 + $0x10] sm:$0xff]  ;;  %v103_v7 = vshrl.u32 %v102_v6, 7 }
  0x3b   :  { %282 = vmatprep.subr.bf16.mxu0 %v711_v10  ;;  %v774_v57 = vld [vmem:[#allocation7 + $0xd4] ss:$8 sps:$4 sm:$0xff]   ;;  %v66_v58 = vpack.c.bf16 %v64_v56, %v62_v55  ;;  %v776_v59 = vld [vmem:[#allocation7 + $0xd0] ss:$8 sps:$4 sm:$0xff]   ;;  %v777_v60 = vld [vmem:[#allocation7 + $0xc4] ss:$8 sps:$4 sm:$0xff]  }
  0x3c   :  { %532 = vmatpush1.bf16.msra.mxu1 %v755_v29  ;;  %v779_v61 = vld [vmem:[#allocation7 + $0xc0] ss:$8 sps:$4 sm:$0xff]   ;;  %v780_v62 = vld [vmem:[#allocation7 + $0xb4] ss:$8 sps:$4 sm:$0xff]   ;;  %v782_v63 = vld [vmem:[#allocation7 + $0xb0] ss:$8 sps:$4 sm:$0xff]  }
  0x3d   :  { %533 = vmatprep.subr.bf16.mxu1 %v756_v31  ;;  %v783_v0 = vld [vmem:[#allocation7 + $0xa4] ss:$8 sps:$4 sm:$0xff]   ;;  %v785_v1 = vld [vmem:[#allocation7 + $0xa0] ss:$8 sps:$4 sm:$0xff]   ;;  %v786_v2 = vld [vmem:[#allocation7 + $0x94] ss:$8 sps:$4 sm:$0xff]  }
  0x3e   :  { %283 = vmatpush1.bf16.msra.mxu0 %v713_v11  ;;  %v788_v3 = vld [vmem:[#allocation7 + $0x90] ss:$8 sps:$4 sm:$0xff]   ;;  %v789_v4 = vld [vmem:[#allocation7 + $0x84] ss:$8 sps:$4 sm:$0xff]   ;;  %v791_v5 = vld [vmem:[#allocation7 + $0x80] ss:$8 sps:$4 sm:$0xff]  }
  0x3f   :  { %284 = vmatprep.subr.bf16.mxu0 %v714_v12  ;;  %v108_v8 = vsub.s32 1, %v103_v7  ;;  %v104_v9 = vsub.s32 0, %v103_v7  ;;  %v100_v10 = vld [vmem:[%s961_s2] sm:$0x3] }
  0x40   :  { %534 = vmatpush1.bf16.msra.mxu1 %v758_v33  ;;  %v353_v27 = vld [vmem:[%s963_s4] sm:$0x3]  ;;  %s901_s4 = smov [#allocation8]  }
  0x41   :  { %535 = vmatprep.subr.bf16.mxu1 %v759_v35  ;;  %v109_v12 = vrot.slane %v100_v10, %v108_v8  ;;  %v105_v13 = vrot.slane %v100_v10, %v104_v9  ;;  %v362_v29 = vrot.slane %v353_v27, %v108_v8  ;;  %s607_s12 = sshll.u32 %s901_s4, 4  ;;  %s608_s12 = int_to_ptr.vmem [resolvable:$true] %s607_s12 }
  0x42   :  { %285 = vmatpush1.bf16.msra.mxu0 %v716_v15  ;;  %s868_s13 = scalar_lea.vmem %s608_s12, 256  ;;  %p873_p2 = scmp.lt.s32.totalorder %s608_s12, %s608_s12 }
  0x43   :  { %286 = vmatprep.subr.bf16.mxu0 %v717_v16  ;;  %p869_p1 = scmp.ne.s32.totalorder %s608_s12, %s868_s13  ;;  %p874_p3 = scmp.lt.s32.totalorder %s868_s13, %s868_s13 }
  0x44   :  { %536 = vmatpush1.bf16.msra.mxu1 %v761_v37 }
  0x45   :  { %537 = vmatprep.subr.bf16.mxu1 %v762_v39  ;;  %p875_p4 = por %p874_p3, %p873_p2 }
  0x46   :  { %287 = vmatpush1.bf16.msra.mxu0 %v719_v22 }
  0x47   :  { %288 = vmatprep.subr.bf16.mxu0 %v720_v24  ;;  %p876_p5 = pnand %p875_p4, %p869_p1 }
  0x48   :  { %538 = vmatpush1.bf16.msra.mxu1 %v764_v41 }
  0x49   :  { %539 = vmatprep.subr.bf16.mxu1 %v765_v43 }
  0x4a   :  { %289 = vmatpush2.bf16.msra.mxu0 %v722_v26 }
  0x4b   :  { %290 = vmatprep.subr.bf16.mxu0 %v723_v28  ;;  %v358_v28 = vrot.slane %v353_v27, %v104_v9 }
  0x4c   :  { %540 = vmatpush1.bf16.msra.mxu1 %v767_v45 }
  0x4d   :  { %541 = vmatprep.subr.bf16.mxu1 %v768_v47 }
  0x4e   :  { %291 = vmatpush2.bf16.msra.mxu0 %v725_v30 }
  0x4f   :  { %292 = vmatprep.subr.bf16.mxu0 %v726_v32 }
  0x50   :  { %542 = vmatpush2.bf16.msra.mxu1 %v770_v49 }
  0x51   :  { %543 = vmatprep.subr.bf16.mxu1 %v771_v51 }
  0x52   :  { %293 = vmatpush2.bf16.msra.mxu0 %v728_v34 }
  0x53   :  { %294 = vmatprep.subr.bf16.mxu0 %v729_v36 }
  0x54   :  { %544 = vmatpush2.bf16.msra.mxu1 %v773_v54 }
  0x55   :  { %545 = vmatprep.subr.bf16.mxu1 %v774_v57 }
  0x56   :  { %295 = vmatpush2.bf16.msra.mxu0 %v731_v38 }
  0x57   :  { %296 = vmatprep.subr.bf16.mxu0 %v732_v40 }
  0x58   :  { %546 = vmatpush2.bf16.msra.mxu1 %v776_v59 }
  0x59   :  { %547 = vmatprep.subr.bf16.mxu1 %v777_v60 }
  0x5a   :  { %297 = vmatpush2.bf16.msra.mxu0 %v734_v42 }
  0x5b   :  { %298 = vmatprep.subr.bf16.mxu0 %v735_v44 }
  0x5c   :  { %548 = vmatpush2.bf16.msra.mxu1 %v779_v61 }
  0x5d   :  { %549 = vmatprep.subr.bf16.mxu1 %v780_v62 }
  0x5e   :  { %299 = vmatpush2.bf16.msra.mxu0 %v737_v46 }
  0x5f   :  { %300 = vmatprep.subr.bf16.mxu0 %v738_v48 }
  0x60   :  { %550 = vmatpush2.bf16.msra.mxu1 %v782_v63 }
  0x61   :  { %551 = vmatprep.subr.bf16.mxu1 %v783_v0 }
  0x62   :  { %301 = vmatpush2.bf16.msra.mxu0 %v740_v50 }
  0x63   :  { %302 = vmatprep.subr.bf16.mxu0 %v741_v52 }
  0x64   :  { %552 = vmatpush2.bf16.msra.mxu1 %v785_v1 }
  0x65   :  { %553 = vmatprep.subr.bf16.mxu1 %v786_v2 }
  0x66   :  { %303 = vmatpush2.bf16.msra.mxu0 %v743_v53 }
  0x68   :  { %554 = vmatpush2.bf16.msra.mxu1 %v788_v3 }
  0x69   :  { %305 = vmatmul.mubr.bf16.vlgmr.msra.gmra.mxu0 %v66_v58  ;;  %555 = vmatprep.subr.bf16.mxu1 %v789_v4 }
  0x6c   :  { %556 = vmatpush2.bf16.msra.mxu1 %v791_v5 }
 0x129   :  { %v306_v11 = vpop.f32.mrf.mxu0 }
 0x12a   :  { %v307_v18 = vadd.f32 %v306_v11, %v105_v13 }
 0x12b   :  { %v308_v14 = vpop.f32.mrf.mxu0 }
 0x12c   :  { %v309_v16 = vadd.f32 %v308_v14, %v109_v12  ;;  %v315_v24 = vmax.f32 %v307_v18, 0.0 }
 0x12d   :  { %v310_v15 = vpop.f32.mrf.mxu0 }
 0x12e   :  { %v311_v17 = vadd.f32 %v310_v15, %v105_v13  ;;  %v316_v22 = vmax.f32 %v309_v16, 0.0 }
 0x12f   :  { %v312_v19 = vpop.f32.mrf.mxu0 }
 0x130   :  { %v313_v20 = vadd.f32 %v312_v19, %v109_v12  ;;  %v317_v21 = vmax.f32 %v311_v17, 0.0 }
 0x132   :  { %v318_v23 = vmax.f32 %v313_v20, 0.0  ;;  %v319_v26 = vpack.c.bf16 %v317_v21, %v315_v24 }
 0x134   :  { %v320_v25 = vpack.c.bf16 %v318_v23, %v316_v22 }
 0x136   :  { %557 = vmatprep.mubr.bf16.mxu1 %v320_v25 }
 0x137   :  { %558 = vmatmul.mubr.bf16.vlgmr.msra.gmra.mxu1 %v319_v26 }
 0x1f7   :  { %v559_v30 = vpop.f32.mrf.mxu1 }
 0x1f8   :  { %v560_v31 = vadd.f32 %v559_v30, %v358_v28 }
 0x1f9   :  { %v561_v32 = vpop.f32.mrf.mxu1 }
 0x1fa   :  { %v568_v33 = vsub.f32 0.0, %v560_v31  ;;  %v562_v34 = vadd.f32 %v561_v32, %v362_v29 }
 0x1fb   :  { %v563_v35 = vpop.f32.mrf.mxu1 }
 0x1fc   :  { %v572_v36 = vmul.f32 1.442695, %v568_v33  ;;  %v569_v37 = vsub.f32 0.0, %v562_v34  ;;  %v564_v38 = vadd.f32 %v563_v35, %v358_v28 }
 0x1fd   :  { %v565_v39 = vpop.f32.mrf.mxu1 }
 0x1fe   :  { %792 = vpow2.f32 %v572_v36  ;;  %v574_v40 = vmul.f32 1.442695, %v569_v37  ;;  %v570_v41 = vsub.f32 0.0, %v564_v38  ;;  %v566_v42 = vadd.f32 %v565_v39, %v362_v29 }
 0x200   :  { %794 = vpow2.f32 %v574_v40  ;;  %v576_v43 = vmul.f32 1.442695, %v570_v41  ;;  %v571_v44 = vsub.f32 0.0, %v566_v42 }
 0x202   :  { %796 = vpow2.f32 %v576_v43  ;;  %v578_v45 = vmul.f32 1.442695, %v571_v44 }
 0x204   :  { %798 = vpow2.f32 %v578_v45 }
 0x20b   :  { %v793_v46 = vpop.eup %792 }
 0x20c   :  { %v580_v47 = vadd.f32 1.0, %v793_v46 }
 0x20d   :  { %v795_v48 = vpop.eup %794 }
 0x20e   :  { %v581_v49 = vadd.f32 1.0, %v795_v48  ;;  %800 = vrcp.f32 %v580_v47 }
 0x20f   :  { %v797_v50 = vpop.eup %796 }
 0x210   :  { %802 = vrcp.f32 %v581_v49  ;;  %v582_v51 = vadd.f32 1.0, %v797_v50 }
 0x211   :  { %v799_v52 = vpop.eup %798 }
 0x212   :  { %v583_v53 = vadd.f32 1.0, %v799_v52  ;;  %804 = vrcp.f32 %v582_v51 }
 0x214   :  { %806 = vrcp.f32 %v583_v53 }
 0x21b   :  { %v801_v54 = vpop.eup %800 }
 0x21d   :  { %v803_v55 = vpop.eup %802 }
 0x21e   :  { %v686_v56 = vpack.c.bf16 %v803_v55, %v801_v54 }
 0x21f   :  { %v805_v57 = vpop.eup %804 }
 0x220   :  { %600 = vst [vmem:[#allocation8] sm:$0xff] %v686_v56 }
 0x221   :  { %v807_v58 = vpop.eup %806 }
 0x222   :  { %v687_v59 = vpack.c.bf16 %v807_v58, %v805_v57 }
 0x224   :  { %601 = vst [vmem:[#allocation8 + $0x8] sm:$0xff] %v687_v59 }
 0x225   :  { %879 = shalt.err (!%p876_p5)
}
 0x226   :  { %613 = dma.vmem_to_hbm [thread:$0]  %s608_s12, 256, %s964_s5, [#allocation4], %s895_s21, %s895_s21, %s896_s22  }
 0x227   :  { %892 = dma.done.wait [#allocation4], 256  }
 0x228   :  { %893 = vsyncadd [#allocation4], 4294967040 }
 0x229   :  { %617 = vsyncpa [#allocation3], 1 }
 0x22a   :  { %618 = vsyncpa [#allocation6], 1 }
 0x22b   :  { %619 = vsyncpa [#allocation4], 1 }

</bundles_post_ra>
